<compile_context>
chip_gen: v7x
topology: tpu7x:2x2x1
jax: 0.10.0
libtpu: 0.0.40
codegen_flags: <defaults>
</compile_context>

<pallas_src>
import jax
import jax.numpy as jnp
from jax.experimental import pallas as pl
from jax.experimental.pallas import tpu as pltpu


MAX_TILE_ROWS = 4096       # (4096, 128) f32 tile = 2 MiB per input buffer
NUM_SHARDS = 2             # outer "parallel" axis -> 2 TCs on v7x
_VMEM_LIMIT = 32 * 1024 * 1024


def _make_kernel(tile_rows, steps_per_shard, total_rows, needs_mask):
    def kernel(a_ref, b_ref, f_ref, out_ref):
        s = pl.program_id(0)          # shard (parallel)
        j = pl.program_id(1)          # accumulation step (arbitrary)

        @pl.when(j == 0)
        def _():
            out_ref[...] = jnp.zeros_like(out_ref)

        # Elementwise hot path on the VPU (upcast in-kernel, not in wrapper).
        a = a_ref[...].astype(jnp.float32)
        b = b_ref[...].astype(jnp.float32)
        f = f_ref[...].astype(jnp.float32)
        diff = jnp.abs(jnp.maximum(a, b) - f)

        if needs_mask:
            # Mask rows beyond the true extent: the ragged last block (whose
            # out-of-bounds tail is undefined data) and any shard-tail blocks
            # whose index_map was clamped contribute zero.
            block_idx = s * steps_per_shard + j
            row_ids = block_idx * tile_rows + jax.lax.broadcasted_iota(
                jnp.int32, (tile_rows, 128), 0
            )
            diff = jnp.where(row_ids < total_rows, diff, 0.0)

        # Sublane-group partial sums: (tile_rows, 128) -> (8, 128).  Keeps the
        # expensive cross-lane reduce out of the streaming loop and gives 1024
        # parallel f32 accumulators (better summation accuracy).
        partial = jnp.sum(diff.reshape(tile_rows // 8, 8, 128), axis=0)
        out_ref[0] += partial

    return kernel


def l_intensity_loss(image_A, image_B, image_fused):
    """Pallas TPU version of L_Intensity.forward. Returns a scalar f32."""
    assert image_A.shape == image_B.shape == image_fused.shape
    n_elem = int(image_A.size)

    rows_exact = -(-n_elem // 128)          # ceil(n / 128)
    if rows_exact >= MAX_TILE_ROWS:
        rows = rows_exact                   # ragged last block masked in-kernel
        tile_rows = MAX_TILE_ROWS
    else:
        rows = ((rows_exact + 7) // 8) * 8  # tiny input: round rows up to x8
        tile_rows = rows                    # single full-extent block per shard
    pad_elems = rows * 128 - n_elem         # lane pad only (zeros contribute 0)

    def _flatten(x):
        x = x.reshape(-1)                   # free for contiguous arrays
        if pad_elems:
            x = jnp.pad(x, (0, pad_elems))  # only when n_elem % 128 != 0 (or tiny)
        return x.reshape(rows, 128)

    a2 = _flatten(image_A)
    b2 = _flatten(image_B)
    f2 = _flatten(image_fused)

    total_blocks = pl.cdiv(rows, tile_rows)
    steps_per_shard = pl.cdiv(total_blocks, NUM_SHARDS)
    # Masking is only required when a ragged last block exists (undefined
    # out-of-bounds tail) or when shard tails were clamped to duplicate blocks.
    needs_mask = (rows % tile_rows != 0) or (
        steps_per_shard * NUM_SHARDS != total_blocks
    )

    kernel = _make_kernel(tile_rows, steps_per_shard, rows, needs_mask)

    # Clamp the block index so shard-tail steps never issue an OOB DMA; their
    # contribution is zeroed by the in-kernel row mask.
    def in_map(s, j):
        return (jnp.minimum(s * steps_per_shard + j, total_blocks - 1), 0)

    in_spec = pl.BlockSpec((tile_rows, 128), in_map)

    out = pl.pallas_call(
        kernel,
        out_shape=jax.ShapeDtypeStruct((NUM_SHARDS, 8, 128), jnp.float32),
        grid=(NUM_SHARDS, steps_per_shard),
        in_specs=[in_spec, in_spec, in_spec],
        out_specs=pl.BlockSpec((1, 8, 128), lambda s, j: (s, 0, 0)),
        compiler_params=pltpu.CompilerParams(
            dimension_semantics=("parallel", "arbitrary"),
            vmem_limit_bytes=_VMEM_LIMIT,
        ),
    )(a2, b2, f2)

    # Single tiny cross-lane reduce + mean normalization outside the hot loop.
    return jnp.sum(out) * jnp.float32(1.0 / n_elem)


def _ref_loss(a, b, f):
    return jnp.mean(jnp.abs(jnp.maximum(a, b) - f))


if __name__ == "__main__":
    key = jax.random.PRNGKey(0)

    # Primary small-shape check (module-consistent N, C, H, W).
    kA, kB, kF = jax.random.split(key, 3)
    shape = (2, 4, 16, 16)
    image_A = jax.random.uniform(kA, shape, dtype=jnp.float32)
    image_B = jax.random.uniform(kB, shape, dtype=jnp.float32)
    image_fused = jax.random.uniform(kF, shape, dtype=jnp.float32)

    loss = l_intensity_loss(image_A, image_B, image_fused)
    loss = jax.block_until_ready(loss)
    ref = _ref_loss(image_A, image_B, image_fused)
    assert jnp.allclose(loss, ref, rtol=2e-5, atol=1e-6), (loss, ref)

    # Secondary check: exercises lane padding, multi-block streaming and the
    # ragged / clamped-shard masking paths.
    kA2, kB2, kF2 = jax.random.split(jax.random.PRNGKey(1), 3)
    shape2 = (2, 3, 300, 301)   # 541800 elems -> 4233 rows -> 2 ragged blocks
    a2 = jax.random.uniform(kA2, shape2, dtype=jnp.float32)
    b2 = jax.random.uniform(kB2, shape2, dtype=jnp.float32)
    f2 = jax.random.uniform(kF2, shape2, dtype=jnp.float32)

    loss2 = jax.block_until_ready(l_intensity_loss(a2, b2, f2))
    ref2 = _ref_loss(a2, b2, f2)
    assert jnp.allclose(loss2, ref2, rtol=2e-5, atol=1e-6), (loss2, ref2)

    print("KERNEL_OK")
</pallas_src>

<mosaic_0001>
module attributes {stable_mosaic.version = 11 : i64} {
  func.func @kernel(%arg0: i32, %arg1: i32, %arg2: memref<16x128xf32, #tpu.memory_space<vmem>>, %arg3: memref<16x128xf32, #tpu.memory_space<vmem>>, %arg4: memref<16x128xf32, #tpu.memory_space<vmem>>, %arg5: memref<1x8x128xf32, #tpu.memory_space<vmem>>) attributes {dimension_semantics = [#tpu.dimension_semantics<parallel>, #tpu.dimension_semantics<arbitrary>], iteration_bounds = array<i64: 2, 1>, scalar_prefetch = 0 : i64, scratch_operands = 0 : i64, tpu.core_type = #tpu.core_type<tc>, window_params = [{transform_indices = @transform_0, window_bounds = array<i64: 16, 128>}, {transform_indices = @transform_1, window_bounds = array<i64: 16, 128>}, {transform_indices = @transform_2, window_bounds = array<i64: 16, 128>}, {transform_indices = @transform_3, window_bounds = array<i64: 1, 8, 128>}]} {
    %c0_i32 = arith.constant 0 : i32
    %0 = arith.cmpi eq, %arg1, %c0_i32 : i32
    %1 = arith.extui %0 : i1 to i32
    %c0_i32_0 = arith.constant 0 : i32
    %2 = arith.cmpi ne, %1, %c0_i32_0 : i32
    scf.if %2 {
      %cst_14 = arith.constant 0.000000e+00 : f32
      %27 = vector.broadcast %cst_14 : f32 to vector<1x8x128xf32>
      %c0_15 = arith.constant 0 : index
      %c0_16 = arith.constant 0 : index
      %c0_17 = arith.constant 0 : index
      %28 = vector.load %arg5[%c0_15, %c0_16, %c0_17] : memref<1x8x128xf32, #tpu.memory_space<vmem>>, vector<1x8x128xf32>
      tpu.vector_store %arg5[%c0_15, %c0_16, %c0_17], %27 {strides = array<i32>} : memref<1x8x128xf32, #tpu.memory_space<vmem>>, vector<1x8x128xf32>,
    } else {
    }
    %c0 = arith.constant 0 : index
    %c0_1 = arith.constant 0 : index
    %3 = vector.load %arg2[%c0, %c0_1] : memref<16x128xf32, #tpu.memory_space<vmem>>, vector<16x128xf32>
    %c0_2 = arith.constant 0 : index
    %c0_3 = arith.constant 0 : index
    %4 = vector.load %arg3[%c0_2, %c0_3] : memref<16x128xf32, #tpu.memory_space<vmem>>, vector<16x128xf32>
    %c0_4 = arith.constant 0 : index
    %c0_5 = arith.constant 0 : index
    %5 = vector.load %arg4[%c0_4, %c0_5] : memref<16x128xf32, #tpu.memory_space<vmem>>, vector<16x128xf32>
    %6 = arith.maximumf %3, %4 : vector<16x128xf32>
    %7 = arith.subf %6, %5 : vector<16x128xf32>
    %8 = math.absf %7 : vector<16x128xf32>
    %c1_i32 = arith.constant 1 : i32
    %9 = arith.muli %arg0, %c1_i32 : i32
    %10 = arith.addi %9, %arg1 : i32
    %c16_i32 = arith.constant 16 : i32
    %11 = arith.muli %10, %c16_i32 : i32
    %12 = tpu.iota {dimensions = array<i32: 0>} : vector<16x128xi32>
    %13 = vector.broadcast %11 : i32 to vector<16x128xi32>
    %14 = arith.addi %13, %12 : vector<16x128xi32>
    %c16_i32_6 = arith.constant 16 : i32
    %15 = vector.broadcast %c16_i32_6 : i32 to vector<16x128xi32>
    %16 = arith.cmpi slt, %14, %15 : vector<16x128xi32>
    %cst = arith.constant 0.000000e+00 : f32
    %17 = vector.broadcast %cst : f32 to vector<16x128xf32>
    %18 = arith.select %16, %8, %17 : vector<16x128xi1>, vector<16x128xf32>
    %19 = vector.shape_cast %18 : vector<16x128xf32> to vector<2x8x128xf32>
    %cst_7 = arith.constant dense<0.000000e+00> : vector<8x128xf32>
    %20 = vector.multi_reduction <add>, %19, %cst_7 [0] : vector<2x8x128xf32> to vector<8x128xf32>
    %c0_8 = arith.constant 0 : index
    %c0_9 = arith.constant 0 : index
    %c0_10 = arith.constant 0 : index
    %21 = vector.load %arg5[%c0_8, %c0_9, %c0_10] : memref<1x8x128xf32, #tpu.memory_space<vmem>>, vector<1x8x128xf32>
    %22 = vector.shape_cast %21 : vector<1x8x128xf32> to vector<8x128xf32>
    %23 = arith.addf %22, %20 : vector<8x128xf32>
    %c0_11 = arith.constant 0 : index
    %c0_12 = arith.constant 0 : index
    %c0_13 = arith.constant 0 : index
    %24 = vector.load %arg5[%c0_11, %c0_12, %c0_13] : memref<1x8x128xf32, #tpu.memory_space<vmem>>, vector<1x8x128xf32>
    %25 = vector.shape_cast %24 : vector<1x8x128xf32> to vector<8x128xf32>
    %26 = vector.shape_cast %23 : vector<8x128xf32> to vector<1x8x128xf32>
    tpu.vector_store %arg5[%c0_11, %c0_12, %c0_13], %26 {strides = array<i32>} : memref<1x8x128xf32, #tpu.memory_space<vmem>>, vector<1x8x128xf32>,
    return
  }
  func.func @transform_0(%arg0: i32, %arg1: i32) -> (i32, i32) {
    %c1_i32 = arith.constant 1 : i32
    %0 = arith.muli %arg0, %c1_i32 : i32
    %1 = arith.addi %0, %arg1 : i32
    %c0_i32 = arith.constant 0 : i32
    %2 = arith.minsi %1, %c0_i32 : i32
    %c0_i32_0 = arith.constant 0 : i32
    %c0_i32_1 = arith.constant 0 : i32
    return %2, %c0_i32_0 : i32, i32
  }
  func.func @transform_1(%arg0: i32, %arg1: i32) -> (i32, i32) {
    %c1_i32 = arith.constant 1 : i32
    %0 = arith.muli %arg0, %c1_i32 : i32
    %1 = arith.addi %0, %arg1 : i32
    %c0_i32 = arith.constant 0 : i32
    %2 = arith.minsi %1, %c0_i32 : i32
    %c0_i32_0 = arith.constant 0 : i32
    %c0_i32_1 = arith.constant 0 : i32
    return %2, %c0_i32_0 : i32, i32
  }
  func.func @transform_2(%arg0: i32, %arg1: i32) -> (i32, i32) {
    %c1_i32 = arith.constant 1 : i32
    %0 = arith.muli %arg0, %c1_i32 : i32
    %1 = arith.addi %0, %arg1 : i32
    %c0_i32 = arith.constant 0 : i32
    %2 = arith.minsi %1, %c0_i32 : i32
    %c0_i32_0 = arith.constant 0 : i32
    %c0_i32_1 = arith.constant 0 : i32
    return %2, %c0_i32_0 : i32, i32
  }
  func.func @transform_3(%arg0: i32, %arg1: i32) -> (i32, i32, i32) {
    %c0_i32 = arith.constant 0 : i32
    %c0_i32_0 = arith.constant 0 : i32
    %c0_i32_1 = arith.constant 0 : i32
    return %arg0, %c0_i32, %c0_i32_0 : i32, i32, i32
  }
}

</mosaic_0001>

<bundles_post_ra>
// kernel: tpu_custom_call.1
= control target key start
LH: loop header
LB: loop body
LE: loop exit
PB: predicated region body
PF: predicated region fallthrough
CT: control target
= control target key end

     0   :  { %s1080_s0 = inlined_call_operand.hbm [shape: f32[16,128], index: 0, kind: input, shape index: {}]   ;;  %s1081_s1 = inlined_call_operand.hbm [shape: f32[16,128], index: 1, kind: input, shape index: {}]   ;;  %s1082_s2 = inlined_call_operand.hbm [shape: f32[16,128], index: 2, kind: input, shape index: {}]   ;;  %s1083_s3 = inlined_call_operand.hbm [shape: f32[2,8,128], index: 3, kind: output, shape index: {}]  }
   0x1   :  { %1090 = sst [smem:[#allocation15_spill]] %s1081_s1 }
   0x2   :  { %8 = vsyncpa [#allocation3], 0 }
   0x3   :  { %10 = vsyncpa [#allocation3 + $0x1], 0 }
   0x4   :  { %11 = vsyncpa [#allocation6], 0 }
   0x5   :  { %13 = vsyncpa [#allocation6 + $0x1], 0 }
   0x6   :  { %14 = vsyncpa [#allocation4], 0 }
   0x7   :  { %16 = vsyncpa [#allocation4 + $0x1], 0  ;;  %s835_s12 = smov 0   ;;  %s837_s13 = smov 0  }
   0x8   :  { %s839_s14 = smov 0   ;;  %s841_s15 = smov 0  }
   0x9   :  { %s843_s16 = smov 0   ;;  %s845_s17 = smov 0  }
   0xa   :  { %s847_s18 = smov 0   ;;  %s849_s19 = smov 0  }
   0xb LB: > { %1091 = sst [smem:[#allocation12_spill]] %s803_s18  ;;  %s874_s20 = sadd.s32 4294967295, %s807_s19   ;;  %s807_s19 = sphi %s849_s19, %s22_s19   ;;  %s803_s18 = sphi %s847_s18, %s1112_s18   ;;  %s799_s17 = sphi %s845_s17, %s1111_s17   ;;  %s795_s16 = sphi %s843_s16, %s1070_s16   ;;  %s791_s15 = sphi %s841_s15, %s1116_s15   ;;  %s787_s14 = sphi %s839_s14, %s1115_s14   ;;  %s783_s13 = sphi %s837_s13, %s1114_s13   ;;  %s779_s12 = sphi %s835_s12, %s1113_s12  }
   0xc   : > { %s486_s21 = sadd.s32 4294967294, %s807_s19   ;;  %s34_s22 = sadd.s32 1, %s803_s18 }
   0xd   : > { %p36_p0 = scmp.ge.s32.totalorder %s34_s22, 2  ;;  %p776_p1 = scmp.ne.s32.totalorder %s795_s16, 0 }
   0xe   : > { %p55_p2 = scmp.eq.s32.totalorder %s807_s19, 0  ;;  %p60_p3 = scmp.ne.s32.totalorder %s795_s16, %s791_s15 }
   0xf   : > { %s1118_s22 = smov (%p36_p0, %s34_s22), 0  ;;  %p61_p5 = scmp.eq.s32.totalorder %s874_s20, 0 }
  0x10   : > { %1092 = sst [smem:[#allocation13_spill]] %s1118_s22  ;;  %p883_p4 = por %p776_p1, %p55_p2 }
  0x11   : > { %p888_p6 = por %p61_p5, %p60_p3  ;;  %s134_s25 = ssub.s32 %s803_s18, %s1118_s22 }
  0x12   : > { %p135_p7 = scmp.eq.s32.totalorder %s134_s25, 0  ;;  %s137_s26 = sadd.s32 1, %s787_s14 }
  0x13   : > { %s1094_s24 = scalar_select %p888_p6, 1, 0 }
  0x14   : > { %s896_s27 = scalar_select %p135_p7, %s787_s14, %s137_s26  }
  0x15   : > { %p147_p8 = scmp.ne.s32.totalorder %s787_s14, %s783_s13  ;;  %p148_p9 = scmp.eq.s32.totalorder %s874_s20, 1 }
  0x16   : > { %1095 = sst [smem:[#allocation14_spill]] %s896_s27  ;;  %p153_p10 = scmp.ne.s32.totalorder %s783_s13, %s779_s12 }
  0x17   : > { %p154_p11 = scmp.eq.s32.totalorder %s486_s21, 1  ;;  %p903_p12 = por %p148_p9, %p147_p8 }
  0x18   : > { %p533_p1 = scmp.lt.s32.totalorder %s807_s19, 2  ;;  %s198_s4 = sand.u32 1, %s807_s19  }
  0x19   : > { %s1096_s28 = scalar_select %p903_p12, 1, 0 }
  0x1a   : > { %p908_p0 = por %p154_p11, %p153_p10  ;;  %p915_p2 = pnand %p533_p1, %p883_p4 }
  0x1b   : > { %s809_s5 = smov [#allocation5]   ;;  %s923_s7 = scalar_lea.sflag [#allocation6], %s198_s4 }
  0x1c   : > { %s1097_s29 = scalar_select %p908_p0, 1, 0 }
  0x1d   : > { %s1098_s30 = scalar_select %p915_p2, 1, 0 }
  0x1e   : > { %s212_s6 = sshll.u32 %s809_s5, 4  ;;  %s1099_s1 = sld [smem:[#allocation15_spill]]  ;;  %s920_s6 = int_to_ptr.vmem [resolvable:$true] %s212_s6 }
  0x1f   : > { %p933_p5 = pneg %p915_p2 }
  0x24   : > { %s610_s10 = scalar_lea.hbm %s1099_s1, 256 }
  0x25   : > { %p611_p4 = scmp.ne.s32.totalorder %s1099_s1, %s610_s10  ;;  %p617_p9 = scmp.lt.u32.totalorder %s610_s10, %s610_s10 }
  0x26   : > { %p619_p10 = scmp.lt.u32.totalorder %s610_s10, %s1099_s1 }
  0x27   : > { %p613_p7 = pnand %p933_p5, %p611_p4 }
  0x28   : > { %p620_p11 = por %p619_p10, %p617_p9 }
  0x29   : > { %p614_p8 = pneg %p613_p7 }
  0x2b   : > { %p621_p1 = pnand %p620_p11, %p614_p8 }
  0x2d   : > { %624 = shalt.err (!%p621_p1)
}
  0x2e   : > { %s625_s26 = scalar_lea.vmem %s920_s6, 256  ;;  %s632_s4 = scalar_lea.vmem %s920_s6, 512 }
  0x2f   : > { %p626_p13 = scmp.ne.s32.totalorder %s920_s6, %s625_s26  ;;  %p633_p4 = scmp.lt.s32.totalorder %s920_s6, %s920_s6 }
  0x30   : > { %p634_p7 = scmp.lt.s32.totalorder %s632_s4, %s625_s26 }
  0x31   : > { %p628_p3 = pnand %p626_p13, %p933_p5 }
  0x32   : > { %p635_p12 = por %p634_p7, %p633_p4 }
  0x33   : > { %p629_p0 = pneg %p628_p3 }
  0x35   : > { %p636_p6 = pnand %p635_p12, %p629_p0 }
  0x37   : > { %639 = shalt.err (!%p636_p6)
}
  0x38   : > { %s810_s5 = smov 128   ;;  %s811_s8 = smov 8  }
  0x39   : > { %525 = dma.hbm_to_vmem [thread:$0]  (!%p915_p2), %s1099_s1, 256, %s920_s6, %s923_s7, %s810_s5, %s810_s5, %s811_s8  }
  0x3a   : > { %p244_p13 = scmp.lt.s32.totalorder %s807_s19, 3  ;;  %p1101_p3 = scmp.ge.s32.totalorder %s807_s19, 1 }
  0x3b   : > { %s812_s15 = smov [#allocation2]   ;;  %s640_s4 = scalar_lea.hbm %s1080_s0, 256 }
  0x3c   : > { %p962_p12 = pnand %p1101_p3, %p244_p13  ;;  %s188_s23 = sshll.u32 %s812_s15, 4  ;;  %s189_s23 = int_to_ptr.vmem [resolvable:$true] %s188_s23 }
  0x3d   : > { %p641_p6 = scmp.ne.s32.totalorder %s1080_s0, %s640_s4  ;;  %p647_p9 = scmp.lt.u32.totalorder %s640_s4, %s640_s4 }
  0x3e   : > { %s1102_s11 = scalar_select %p962_p12, 1, 0 }
  0x3f   : > { %p643_p0 = pnand %p641_p6, %p933_p5  ;;  %p649_p10 = scmp.lt.u32.totalorder %s640_s4, %s1080_s0 }
  0x41   : > { %p644_p8 = pneg %p643_p0  ;;  %p650_p11 = por %p649_p10, %p647_p9 }
  0x43   : > { %p651_p1 = pnand %p650_p11, %p644_p8 }
  0x45   : > { %654 = shalt.err (!%p651_p1)
}
  0x46   : > { %s655_s10 = scalar_lea.vmem %s189_s23, 256  ;;  %s662_s15 = scalar_lea.vmem %s189_s23, 512 }
  0x47   : > { %p656_p4 = scmp.ne.s32.totalorder %s189_s23, %s655_s10  ;;  %p663_p3 = scmp.lt.s32.totalorder %s189_s23, %s189_s23 }
  0x48   : > { %p664_p12 = scmp.lt.s32.totalorder %s662_s15, %s655_s10 }
  0x49   : > { %p658_p7 = pnand %p656_p4, %p933_p5 }
  0x4a   : > { %p665_p2 = por %p664_p12, %p663_p3 }
  0x4b   : > { %p659_p13 = pneg %p658_p7 }
  0x4d   : > { %p666_p6 = pnand %p665_p2, %p659_p13 }
  0x4f   : > { %669 = shalt.err (!%p666_p6)
}
  0x50   : > { %p1103_p0 = scmp.ne.s32.totalorder %s1098_s30, 0  ;;  %s813_s25 = smov [#allocation7]  }
  0x51   : > { %s236_s26 = sshll.u32 %s813_s25, 4  ;;  %s670_s9 = scalar_lea.hbm %s1082_s2, 256  ;;  %s237_s26 = int_to_ptr.vmem [resolvable:$true] %s236_s26 }
  0x52   : > { %522 = dma.hbm_to_vmem [thread:$0]  (!%p1103_p0), %s1080_s0, 256, %s189_s23, [#allocation3], %s810_s5, %s810_s5, %s811_s8  }
  0x53   : > { %p671_p2 = scmp.ne.s32.totalorder %s1082_s2, %s670_s9  ;;  %p677_p9 = scmp.lt.u32.totalorder %s670_s9, %s670_s9 }
  0x54   : > { %p679_p10 = scmp.lt.u32.totalorder %s670_s9, %s1082_s2 }
  0x55   : > { %p673_p12 = pnand %p671_p2, %p933_p5 }
  0x56   : > { %p680_p11 = por %p679_p10, %p677_p9 }
  0x57   : > { %p674_p8 = pneg %p673_p12 }
  0x59   : > { %p681_p1 = pnand %p680_p11, %p674_p8 }
  0x5b   : > { %684 = shalt.err (!%p681_p1)
}
  0x5c   : > { %s685_s23 = scalar_lea.vmem %s237_s26, 256  ;;  %s692_s18 = scalar_lea.vmem %s237_s26, 512 }
  0x5d   : > { %p686_p4 = scmp.ne.s32.totalorder %s237_s26, %s685_s23  ;;  %p693_p3 = scmp.lt.s32.totalorder %s237_s26, %s237_s26 }
  0x5e   : > { %p694_p6 = scmp.lt.s32.totalorder %s692_s18, %s685_s23 }
  0x5f   : > { %p688_p7 = pnand %p686_p4, %p933_p5 }
  0x60   : > { %p695_p0 = por %p694_p6, %p693_p3 }
  0x61   : > { %p689_p13 = pneg %p688_p7 }
  0x63   : > { %p696_p2 = pnand %p695_p0, %p689_p13 }
  0x65   : > { %699 = shalt.err (!%p696_p2)
}
  0x66   : > { %p1104_p12 = scmp.ne.s32.totalorder %s1098_s30, 0  ;;  %p1105_p8 = scmp.ne.s32.totalorder %s1102_s11, 0 }
  0x67   : > { %s250_s21 = sand.u32 (!%p1105_p8), 1, %s795_s16   ;;  %p1106_p5 = scmp.ne.s32.totalorder (!%p1105_p8), %s1094_s24, 0 }
  0x68   : > { %528 = dma.hbm_to_vmem [thread:$0]  (!%p1104_p12), %s1082_s2, 256, %s237_s26, %s923_s7, %s810_s5, %s810_s5, %s811_s8  }
  0x69   : > { %248 = sbr.rel (%p1105_p8) target bundleno = 144 (0x90), region = 32  ;;  %s499_s22 = sshll.u32 (!%p1105_p8), %s250_s21, 4 }
  0x6a   : > { %s251_s25 = scalar_lea.sflag (!%p1105_p8), [#allocation3], %s250_s21  ;;  %s254_s4 = scalar_lea.vmem (!%p1105_p8), [#allocation2], %s499_s22 }
  0x70   : > { %765 = dma.done.wait (%p1106_p5), %s251_s25, 256  }
  0x71   : > { %767 = vsyncadd (%p1106_p5), %s251_s25, 4294967040  ;;  %s259_s30 = sand.u32 1, %s874_s20   ;;  %s263_s9 = scalar_lea.vmem [#allocation5], %s499_s22 }
  0x72   : > { %s260_s6 = scalar_lea.sflag [#allocation6], %s259_s30 }
  0x73   : > { %769 = dma.done.wait (%p1106_p5), %s260_s6, 512  }
  0x74   : > { %771 = vsyncadd (%p1106_p5), %s260_s6, 4294966784  ;;  %v336_v0 = vlaneseq  ;;  %s503_s7 = sshll.u32 %s799_s17, 4  ;;  %s302_s5 = sand.u32 1, %s783_s13   ;;  %v322_v4 = vld [vmem:[%s254_s4] sm:$0xff]  ;;  %v323_v5 = vld [vmem:[%s254_s4 + $0x8] sm:$0xff] }
  0x75   : > { %v339_v3 = vstv %s503_s7  ;;  %v324_v6 = vld [vmem:[%s263_s9] sm:$0xff]  ;;  %v325_v8 = vld [vmem:[%s263_s9 + $0x8] sm:$0xff]  ;;  %s272_s20 = scalar_lea.vmem [#allocation7], %s499_s22  ;;  %s502_s24 = sshll.u32 %s302_s5, 3 }
  0x76   : > { %v337_v1 = vshrl.u32 %v336_v0, 7  ;;  %v326_v9 = vld [vmem:[%s272_s20] sm:$0xff]  ;;  %v327_v10 = vld [vmem:[%s272_s20 + $0x8] sm:$0xff]  ;;  %v328_v11 = vmax.f32 %v322_v4, %v324_v6  ;;  %v329_v13 = vmax.f32 %v323_v5, %v325_v8  ;;  %s505_s8 = sshll.u32 %s799_s17, 7  ;;  %s304_s11 = scalar_lea.vmem [#allocation8], %s502_s24 }
  0x77   : > { %s364_s26 = sshll.u32 %s304_s11, 4  ;;  %s1027_s23 = scalar_lea.hbm %s1083_s3, %s505_s8  ;;  %s1029_s26 = int_to_ptr.vmem [resolvable:$true] %s364_s26 }
  0x78   : > { %v338_v2 = vadd.s32 8, %v337_v1  ;;  %v340_v7 = vadd.s32 %v339_v3, %v337_v1  ;;  %v330_v14 = vsub.f32 %v328_v11, %v326_v9  ;;  %v331_v15 = vsub.f32 %v329_v13, %v327_v10  ;;  %s351_s18 = scalar_lea.sflag [#allocation4], %s302_s5  ;;  %s700_s1 = scalar_lea.vmem %s1029_s26, 128 }
  0x79   : > { %p701_p0 = scmp.ne.s32.totalorder %s1029_s26, %s700_s1  ;;  %p1107_p9 = scmp.ne.s32.totalorder %s1096_s28, 0 }
  0x7a   : > { %v341_v12 = vadd.s32 %v339_v3, %v338_v2  ;;  %vm342_vm0 = vcmp.lt.s32.totalorder %v340_v7, 16  ;;  %v332_v16 = vand.u32 2147483647, %v330_v14  ;;  %v333_v17 = vand.u32 2147483647, %v331_v15  ;;  %s814_s17 = smov [#allocation8]  }
  0x7b   : > { %p702_p10 = pnand %p701_p0, %p1107_p9  ;;  %s704_s27 = sshll.u32 %s814_s17, 4  ;;  %s705_s27 = int_to_ptr.vmem [resolvable:$false] %s704_s27 }
  0x7c   : > { %vm343_vm1 = vcmp.lt.s32.totalorder %v341_v12, 16  ;;  %v344_v18 = vsel %vm342_vm0, %v332_v16, 0.0  ;;  %s706_s21 = scalar_lea.vmem %s705_s27, 256  ;;  %p707_p1 = scmp.lt.s32.totalorder %s1029_s26, %s705_s27 }
  0x7d   : > { %v345_v19 = vsel %vm343_vm1, %v333_v17, 0.0  ;;  %p703_p11 = pneg %p702_p10  ;;  %p708_p4 = scmp.lt.s32.totalorder %s706_s21, %s700_s1 }
  0x7e   : > { %v346_v20 = vadd.f32 %v345_v19, %v344_v18 }
  0x7f   : > { %p709_p7 = por %p708_p4, %p707_p1 }
  0x80   : > { %349 = vst [vmem:[%s304_s11] sm:$0xff] %v346_v20 }
  0x81   : > { %p710_p13 = pnand %p709_p7, %p703_p11 }
  0x83   : > { %713 = shalt.err (!%p710_p13)
}
  0x84   : > { %s714_s22 = scalar_lea.hbm %s1027_s23, 128  ;;  %s718_s30 = scalar_lea.hbm %s1083_s3, 256 }
  0x85   : > { %p715_p3 = scmp.ne.s32.totalorder %s1027_s23, %s714_s22  ;;  %p719_p12 = scmp.lt.u32.totalorder %s1027_s23, %s1083_s3 }
  0x86   : > { %p720_p8 = scmp.lt.u32.totalorder %s718_s30, %s714_s22  ;;  %p722_p0 = scmp.lt.u32.totalorder %s714_s22, %s1027_s23 }
  0x87   : > { %p716_p6 = pnand %p715_p3, %p1107_p9 }
  0x88   : > { %p721_p5 = por %p720_p8, %p719_p12 }
  0x89   : > { %p717_p2 = pneg %p716_p6 }
  0x8a   : > { %p723_p10 = por %p722_p0, %p721_p5 }
  0x8c   : > { %p724_p11 = pnand %p723_p10, %p717_p2 }
  0x8e   : > { %727 = shalt.err (!%p724_p11)
}
  0x8f   : > { %517 = dma.vmem_to_hbm [thread:$0]  (%p1107_p9), %s1029_s26, 128, %s1027_s23, %s351_s18  }
  0x90 PF: > { %s376_s7 = sand.u32 1, %s779_s12   ;;  %p1108_p1 = scmp.ne.s32.totalorder %s1097_s29, 0 }
  0x91   : > { %p1109_p4 = scmp.ge.s32.totalorder %s807_s19, 2  ;;  %s377_s5 = scalar_lea.sflag [#allocation4], %s376_s7 }
  0x93   : > { %p530_p7 = pnand %p1109_p4, %p1108_p1 }
  0x95   : > { %773 = dma.done.wait (!%p530_p7), %s377_s5, 128  }
  0x96   : > { %775 = vsyncadd (!%p530_p7), %s377_s5, 4294967168  ;;  %s22_s19 = sadd.s32 1, %s807_s19   ;;  %s1110_s28 = sld [smem:[#allocation14_spill]] }
  0x97   : > { %p19_p13 = scmp.ge.s32.totalorder %s22_s19, 4   ;;  %s1111_s17 = sld [smem:[#allocation12_spill]] }
  0x98   : > { %s1112_s18 = sld [smem:[#allocation13_spill]]  ;;  %s1113_s12 = smov %s783_s13 }
  0x99   : > { %s1114_s13 = smov %s787_s14  ;;  %s1116_s15 = smov %s795_s16 }
  0x9a   : > { %s1070_s16 = smov 0   ;;  %21 = sbr.rel (!%p19_p13) target bundleno = 11 (0xb), region = 105 }
  0x9c   : > { %s1115_s14 = smov %s1110_s28 }
  0xa1   :  { %382 = vsyncpa [#allocation3], 1 }
  0xa2   :  { %384 = vsyncpa [#allocation3 + $0x1], 1 }
  0xa3   :  { %385 = vsyncpa [#allocation6], 1 }
  0xa4   :  { %387 = vsyncpa [#allocation6 + $0x1], 1 }
  0xa5   :  { %388 = vsyncpa [#allocation4], 1 }
  0xa6   :  { %390 = vsyncpa [#allocation4 + $0x1], 1 }

</bundles_post_ra>
